<compile_context>
chip_gen: v6e
topology: v6e:2x2x1
jax: 0.10.0
libtpu: 0.0.40
codegen_flags: <defaults>
</compile_context>

<pallas_src>
import functools

import jax
import jax.numpy as jnp
from jax.experimental import pallas as pl
from jax.experimental.pallas import tpu as pltpu

_SUBLANE = 8    # second-to-last-dim granularity of a vreg
_PACK = 4       # batch rows packed per 128-lane row (h_dim=32 -> 4*32 = 128 lanes)


def _round_up(x: int, m: int) -> int:
    return (x + m - 1) // m * m


def _cdiv(a: int, b: int) -> int:
    return -(-a // b)


def _apply_act(y, act: str):
    if act == "relu":
        return jnp.maximum(y, 0.0)
    elif act == "tanh":
        return jnp.tanh(y)
    elif act == "gelu":
        # PyTorch F.gelu default is the exact (erf) gelu.
        return 0.5 * y * (1.0 + jax.lax.erf(y / jnp.sqrt(2.0).astype(y.dtype)))
    elif act == "sigmoid":
        return jax.nn.sigmoid(y)
    elif act == "sine":
        return jnp.sin(y)
    elif act == "norm":
        # F.normalize(p=2, dim=-1), eps=1e-12.  Only valid when the feature
        # axis is un-packed / un-padded (handled in prepare_mlp_params).
        denom = jnp.maximum(jnp.sqrt(jnp.sum(y * y, axis=-1, keepdims=True)), 1e-12)
        return y / denom
    elif act == "exp":
        return jnp.exp(y)
    else:  # 'none' / 'linear'
        return y


def _fused_mlp_kernel(*refs, acts):
    # refs = (x_ref, w0_ref, b0_ref, ..., w{L-1}_ref, b{L-1}_ref, o_ref)
    # x: [TILE, P*in_dim]; w_i: [P*in_i, P*out_i] (pre-transposed, block-diag);
    # b_i: [1, P*out_i]; o: [TILE, P*out_dim].  Intermediate activations stay
    # in VMEM/vregs for all layers — no HBM round trips.
    x_ref = refs[0]
    o_ref = refs[-1]
    wb_refs = refs[1:-1]

    h = x_ref[...]
    for i, act in enumerate(acts):
        w = wb_refs[2 * i][...]
        b = wb_refs[2 * i + 1][...]
        # Weights already [in, out] -> plain MXU matmul, no in-kernel transpose.
        h = _apply_act(jnp.dot(h, w, preferred_element_type=jnp.float32) + b, act)
    o_ref[...] = h.astype(o_ref.dtype)


def _block_diag(w, p: int):
    """[in, out] -> [p*in, p*out] with p copies of w on the diagonal."""
    idim, odim = w.shape
    out = jnp.zeros((p * idim, p * odim), w.dtype)
    for g in range(p):
        out = out.at[g * idim:(g + 1) * idim, g * odim:(g + 1) * odim].set(w)
    return out


def prepare_mlp_params(params, h_act: str = "tanh", out_act: str = "sigmoid",
                       pack_rows: int = _PACK):
    """One-time weight prep (hoisted out of the per-forward-call path).

    params: list of (w [out, in], b [out]) like torch.nn.Linear.
    Returns (prepped, acts, pack_rows): weights pre-transposed to [in, out] and
    made block-diagonal for `pack_rows` packed batch rows, biases tiled.
    Packing is disabled (pack_rows = 1) if any activation is 'norm'.
    """
    n_layers = len(params)
    acts = tuple(out_act if i == n_layers - 1 else h_act for i in range(n_layers))
    if "norm" in acts:
        pack_rows = 1  # row-packing would mix groups in the L2 reduction
    prepped = []
    for (w, b) in params:
        wt = jnp.asarray(w, jnp.float32).T          # [in, out]
        bb = jnp.asarray(b, jnp.float32)
        if pack_rows > 1:
            wt = _block_diag(wt, pack_rows)         # [P*in, P*out]
            bb = jnp.tile(bb, pack_rows)            # [P*out]
        prepped.append((wt, bb[None, :]))
    return tuple(prepped), acts, pack_rows


@functools.partial(jax.jit, static_argnames=("acts", "pack_rows", "tile_rows"))
def _mlp_forward_impl(x, prepped, *, acts, pack_rows, tile_rows):
    x = jnp.asarray(x, jnp.float32)
    n, in_dim = x.shape
    out_dim_packed = prepped[-1][0].shape[1]
    out_dim = out_dim_packed // pack_rows

    # --- pack `pack_rows` batch rows per 128-lane row (contiguous reshape) ---
    n_packed = _cdiv(n, pack_rows)

    # --- batch tile: as large as the cap allows.  If a single tile would cover
    # the whole batch, split it so the "parallel" grid axis has >=2 steps and
    # v7x can shard the batch over its two TensorCores. ---
    tile = max(_SUBLANE, min(tile_rows, _round_up(n_packed, _SUBLANE)))
    if n_packed <= tile and n_packed > _SUBLANE:
        tile = _round_up(_cdiv(n_packed, 2), _SUBLANE)
    n_packed_pad = _round_up(n_packed, tile)

    n_rows_pad = n_packed_pad * pack_rows
    if n_rows_pad != n:
        x = jnp.pad(x, ((0, n_rows_pad - n), (0, 0)))
    x_p = x.reshape(n_packed_pad, pack_rows * in_dim)   # no lane padding in HBM

    grid = (n_packed_pad // tile,)

    in_specs = [pl.BlockSpec((tile, pack_rows * in_dim), lambda i: (i, 0))]
    flat_args = [x_p]
    for (wt, bb) in prepped:
        # Constant index_map -> weights/biases DMA'd once, resident across grid.
        in_specs.append(pl.BlockSpec(wt.shape, lambda i: (0, 0)))
        in_specs.append(pl.BlockSpec(bb.shape, lambda i: (0, 0)))
        flat_args.append(wt)
        flat_args.append(bb)

    out_p = pl.pallas_call(
        functools.partial(_fused_mlp_kernel, acts=acts),
        out_shape=jax.ShapeDtypeStruct((n_packed_pad, pack_rows * out_dim),
                                       jnp.float32),
        grid=grid,
        in_specs=in_specs,
        out_specs=pl.BlockSpec((tile, pack_rows * out_dim), lambda i: (i, 0)),
        compiler_params=pltpu.CompilerParams(
            dimension_semantics=("parallel",),
            # Explicit scoped-VMEM budget: well under v7x's 64 MiB physical
            # (and v5e/v6e's 128 MiB) while leaving compiler headroom.
            vmem_limit_bytes=48 * 1024 * 1024,
        ),
    )(*flat_args)

    # Unpack: [n_packed_pad, P*out] -> [n_rows_pad, out] -> strip padded rows.
    return out_p.reshape(n_rows_pad, out_dim)[:n]


def mlp_forward(x, prepped, acts, pack_rows=_PACK, tile_rows=2048):
    """Fused MLP forward.  `prepped`/`acts`/`pack_rows` from prepare_mlp_params."""
    return _mlp_forward_impl(x, prepped, acts=acts, pack_rows=pack_rows,
                             tile_rows=tile_rows)


def init_mlp_params(key, in_dim, h_dim, out_dim, num_h_layer=4):
    """Deterministic init mimicking nn.Linear default U[-1/sqrt(fan_in), +]."""
    dims = [(in_dim, h_dim)] + [(h_dim, h_dim)] * num_h_layer + [(h_dim, out_dim)]
    params = []
    for (fan_in, fan_out) in dims:
        key, kw, kb = jax.random.split(key, 3)
        bound = 1.0 / jnp.sqrt(fan_in)
        w = jax.random.uniform(kw, (fan_out, fan_in), jnp.float32, -bound, bound)
        b = jax.random.uniform(kb, (fan_out,), jnp.float32, -bound, bound)
        params.append((w, b))
    return params


def mlp_reference(x, params, h_act="tanh", out_act="sigmoid"):
    # Pure-JAX reference.  precision=HIGHEST pins the f32 matmul path so the
    # comparison is against true f32 math (the in-kernel f32 dots are f32
    # multi-pass on the MXU).
    out = jnp.asarray(x, jnp.float32)
    for i, (w, b) in enumerate(params):
        act = out_act if i == len(params) - 1 else h_act
        y = jnp.dot(out, w.T, precision=jax.lax.Precision.HIGHEST) + b[None, :]
        out = _apply_act(y, act)
    return out


if __name__ == "__main__":
    key = jax.random.PRNGKey(0)
    in_dim, h_dim, out_dim, num_h_layer = 4, 32, 2, 4
    h_act, out_act = "tanh", "sigmoid"

    kx, kp, kx2 = jax.random.split(key, 3)
    params = init_mlp_params(kp, in_dim, h_dim, out_dim, num_h_layer)

    # One-time weight prep (transpose + block-diagonal packing), hoisted out of
    # the per-call path.
    prepped, acts, pack_rows = prepare_mlp_params(params, h_act, out_act)

    # Small batch: single grid step.
    x = jax.random.normal(kx, (8, in_dim), jnp.float32)
    out = jax.block_until_ready(mlp_forward(x, prepped, acts, pack_rows))
    ref = mlp_reference(x, params, h_act, out_act)
    assert out.shape == (8, out_dim)
    # 1e-4 tolerance covers transcendental-approximation differences between
    # Mosaic (in-kernel tanh/sigmoid) and XLA while matmuls are f32-accurate.
    assert jnp.allclose(out, ref, atol=1e-4, rtol=1e-4), "mismatch (batch=8)"

    # Ragged batch: exercises row padding, the packed reshape, and a 2-step
    # "parallel" grid (so v7x can use both TensorCores).
    x2 = jax.random.normal(kx2, (1000, in_dim), jnp.float32)
    out2 = jax.block_until_ready(mlp_forward(x2, prepped, acts, pack_rows))
    ref2 = mlp_reference(x2, params, h_act, out_act)
    assert out2.shape == (1000, out_dim)
    assert jnp.allclose(out2, ref2, atol=1e-4, rtol=1e-4), "mismatch (batch=1000)"

    print("KERNEL_OK")
</pallas_src>

<mosaic_0001>
module attributes {stable_mosaic.version = 11 : i64} {
  func.func @_fused_mlp_kernel(%arg0: i32, %arg1: memref<8x16xf32, #tpu.memory_space<vmem>>, %arg2: memref<16x128xf32, #tpu.memory_space<vmem>>, %arg3: memref<1x128xf32, #tpu.memory_space<vmem>>, %arg4: memref<128x128xf32, #tpu.memory_space<vmem>>, %arg5: memref<1x128xf32, #tpu.memory_space<vmem>>, %arg6: memref<128x128xf32, #tpu.memory_space<vmem>>, %arg7: memref<1x128xf32, #tpu.memory_space<vmem>>, %arg8: memref<128x128xf32, #tpu.memory_space<vmem>>, %arg9: memref<1x128xf32, #tpu.memory_space<vmem>>, %arg10: memref<128x128xf32, #tpu.memory_space<vmem>>, %arg11: memref<1x128xf32, #tpu.memory_space<vmem>>, %arg12: memref<128x8xf32, #tpu.memory_space<vmem>>, %arg13: memref<1x8xf32, #tpu.memory_space<vmem>>, %arg14: memref<8x8xf32, #tpu.memory_space<vmem>>) attributes {dimension_semantics = [#tpu.dimension_semantics<parallel>], iteration_bounds = array<i64: 1>, scalar_prefetch = 0 : i64, scratch_operands = 0 : i64, tpu.core_type = #tpu.core_type<tc>, window_params = [{transform_indices = @transform_0, window_bounds = array<i64: 8, 16>}, {pipeline_mode = #tpu.pipeline_mode<synchronous>, transform_indices = @transform_1, window_bounds = array<i64: 16, 128>}, {pipeline_mode = #tpu.pipeline_mode<synchronous>, transform_indices = @transform_2, window_bounds = array<i64: 1, 128>}, {pipeline_mode = #tpu.pipeline_mode<synchronous>, transform_indices = @transform_3, window_bounds = array<i64: 128, 128>}, {pipeline_mode = #tpu.pipeline_mode<synchronous>, transform_indices = @transform_4, window_bounds = array<i64: 1, 128>}, {pipeline_mode = #tpu.pipeline_mode<synchronous>, transform_indices = @transform_5, window_bounds = array<i64: 128, 128>}, {pipeline_mode = #tpu.pipeline_mode<synchronous>, transform_indices = @transform_6, window_bounds = array<i64: 1, 128>}, {pipeline_mode = #tpu.pipeline_mode<synchronous>, transform_indices = @transform_7, window_bounds = array<i64: 128, 128>}, {pipeline_mode = #tpu.pipeline_mode<synchronous>, transform_indices = @transform_8, window_bounds = array<i64: 1, 128>}, {pipeline_mode = #tpu.pipeline_mode<synchronous>, transform_indices = @transform_9, window_bounds = array<i64: 128, 128>}, {pipeline_mode = #tpu.pipeline_mode<synchronous>, transform_indices = @transform_10, window_bounds = array<i64: 1, 128>}, {pipeline_mode = #tpu.pipeline_mode<synchronous>, transform_indices = @transform_11, window_bounds = array<i64: 128, 8>}, {pipeline_mode = #tpu.pipeline_mode<synchronous>, transform_indices = @transform_12, window_bounds = array<i64: 1, 8>}, {transform_indices = @transform_13, window_bounds = array<i64: 8, 8>}]} {
    %c0 = arith.constant 0 : index
    %c0_0 = arith.constant 0 : index
    %0 = vector.load %arg1[%c0, %c0_0] : memref<8x16xf32, #tpu.memory_space<vmem>>, vector<8x16xf32>
    %c0_1 = arith.constant 0 : index
    %c0_2 = arith.constant 0 : index
    %1 = vector.load %arg2[%c0_1, %c0_2] : memref<16x128xf32, #tpu.memory_space<vmem>>, vector<16x128xf32>
    %c0_3 = arith.constant 0 : index
    %c0_4 = arith.constant 0 : index
    %2 = vector.load %arg3[%c0_3, %c0_4] : memref<1x128xf32, #tpu.memory_space<vmem>>, vector<1x128xf32>
    %cst = arith.constant dense<0.000000e+00> : vector<8x128xf32>
    %3 = tpu.matmul %0, %1, %cst {dimension_numbers = #tpu.dot_dimension_numbers<[1], [0], [0], [1], [0, 0, 1, 1], [], []>} : vector<8x16xf32>, vector<16x128xf32>, vector<8x128xf32> -> vector<8x128xf32>
    %4 = vector.broadcast %2 : vector<1x128xf32> to vector<8x128xf32>
    %5 = arith.addf %3, %4 : vector<8x128xf32>
    %6 = math.tanh %5 : vector<8x128xf32>
    %c0_5 = arith.constant 0 : index
    %c0_6 = arith.constant 0 : index
    %7 = vector.load %arg4[%c0_5, %c0_6] : memref<128x128xf32, #tpu.memory_space<vmem>>, vector<128x128xf32>
    %c0_7 = arith.constant 0 : index
    %c0_8 = arith.constant 0 : index
    %8 = vector.load %arg5[%c0_7, %c0_8] : memref<1x128xf32, #tpu.memory_space<vmem>>, vector<1x128xf32>
    %cst_9 = arith.constant dense<0.000000e+00> : vector<8x128xf32>
    %9 = tpu.matmul %6, %7, %cst_9 {dimension_numbers = #tpu.dot_dimension_numbers<[1], [0], [0], [1], [0, 0, 1, 1], [], []>} : vector<8x128xf32>, vector<128x128xf32>, vector<8x128xf32> -> vector<8x128xf32>
    %10 = vector.broadcast %8 : vector<1x128xf32> to vector<8x128xf32>
    %11 = arith.addf %9, %10 : vector<8x128xf32>
    %12 = math.tanh %11 : vector<8x128xf32>
    %c0_10 = arith.constant 0 : index
    %c0_11 = arith.constant 0 : index
    %13 = vector.load %arg6[%c0_10, %c0_11] : memref<128x128xf32, #tpu.memory_space<vmem>>, vector<128x128xf32>
    %c0_12 = arith.constant 0 : index
    %c0_13 = arith.constant 0 : index
    %14 = vector.load %arg7[%c0_12, %c0_13] : memref<1x128xf32, #tpu.memory_space<vmem>>, vector<1x128xf32>
    %cst_14 = arith.constant dense<0.000000e+00> : vector<8x128xf32>
    %15 = tpu.matmul %12, %13, %cst_14 {dimension_numbers = #tpu.dot_dimension_numbers<[1], [0], [0], [1], [0, 0, 1, 1], [], []>} : vector<8x128xf32>, vector<128x128xf32>, vector<8x128xf32> -> vector<8x128xf32>
    %16 = vector.broadcast %14 : vector<1x128xf32> to vector<8x128xf32>
    %17 = arith.addf %15, %16 : vector<8x128xf32>
    %18 = math.tanh %17 : vector<8x128xf32>
    %c0_15 = arith.constant 0 : index
    %c0_16 = arith.constant 0 : index
    %19 = vector.load %arg8[%c0_15, %c0_16] : memref<128x128xf32, #tpu.memory_space<vmem>>, vector<128x128xf32>
    %c0_17 = arith.constant 0 : index
    %c0_18 = arith.constant 0 : index
    %20 = vector.load %arg9[%c0_17, %c0_18] : memref<1x128xf32, #tpu.memory_space<vmem>>, vector<1x128xf32>
    %cst_19 = arith.constant dense<0.000000e+00> : vector<8x128xf32>
    %21 = tpu.matmul %18, %19, %cst_19 {dimension_numbers = #tpu.dot_dimension_numbers<[1], [0], [0], [1], [0, 0, 1, 1], [], []>} : vector<8x128xf32>, vector<128x128xf32>, vector<8x128xf32> -> vector<8x128xf32>
    %22 = vector.broadcast %20 : vector<1x128xf32> to vector<8x128xf32>
    %23 = arith.addf %21, %22 : vector<8x128xf32>
    %24 = math.tanh %23 : vector<8x128xf32>
    %c0_20 = arith.constant 0 : index
    %c0_21 = arith.constant 0 : index
    %25 = vector.load %arg10[%c0_20, %c0_21] : memref<128x128xf32, #tpu.memory_space<vmem>>, vector<128x128xf32>
    %c0_22 = arith.constant 0 : index
    %c0_23 = arith.constant 0 : index
    %26 = vector.load %arg11[%c0_22, %c0_23] : memref<1x128xf32, #tpu.memory_space<vmem>>, vector<1x128xf32>
    %cst_24 = arith.constant dense<0.000000e+00> : vector<8x128xf32>
    %27 = tpu.matmul %24, %25, %cst_24 {dimension_numbers = #tpu.dot_dimension_numbers<[1], [0], [0], [1], [0, 0, 1, 1], [], []>} : vector<8x128xf32>, vector<128x128xf32>, vector<8x128xf32> -> vector<8x128xf32>
    %28 = vector.broadcast %26 : vector<1x128xf32> to vector<8x128xf32>
    %29 = arith.addf %27, %28 : vector<8x128xf32>
    %30 = math.tanh %29 : vector<8x128xf32>
    %c0_25 = arith.constant 0 : index
    %c0_26 = arith.constant 0 : index
    %31 = vector.load %arg12[%c0_25, %c0_26] : memref<128x8xf32, #tpu.memory_space<vmem>>, vector<128x8xf32>
    %c0_27 = arith.constant 0 : index
    %c0_28 = arith.constant 0 : index
    %32 = vector.load %arg13[%c0_27, %c0_28] : memref<1x8xf32, #tpu.memory_space<vmem>>, vector<1x8xf32>
    %cst_29 = arith.constant dense<0.000000e+00> : vector<8x8xf32>
    %33 = tpu.matmul %30, %31, %cst_29 {dimension_numbers = #tpu.dot_dimension_numbers<[1], [0], [0], [1], [0, 0, 1, 1], [], []>} : vector<8x128xf32>, vector<128x8xf32>, vector<8x8xf32> -> vector<8x8xf32>
    %34 = vector.broadcast %32 : vector<1x8xf32> to vector<8x8xf32>
    %35 = arith.addf %33, %34 : vector<8x8xf32>
    %36 = arith.negf %35 : vector<8x8xf32>
    %37 = math.exp %36 : vector<8x8xf32>
    %cst_30 = arith.constant 1.000000e+00 : f32
    %38 = vector.broadcast %cst_30 : f32 to vector<8x8xf32>
    %39 = arith.addf %38, %37 : vector<8x8xf32>
    %40 = arith.divf %38, %39 : vector<8x8xf32>
    %c0_31 = arith.constant 0 : index
    %c0_32 = arith.constant 0 : index
    %41 = vector.load %arg14[%c0_31, %c0_32] : memref<8x8xf32, #tpu.memory_space<vmem>>, vector<8x8xf32>
    tpu.vector_store %arg14[%c0_31, %c0_32], %40 {strides = array<i32>} : memref<8x8xf32, #tpu.memory_space<vmem>>, vector<8x8xf32>,
    return
  }
  func.func @transform_0(%arg0: i32) -> (i32, i32) {
    %c0_i32 = arith.constant 0 : i32
    %c0_i32_0 = arith.constant 0 : i32
    return %arg0, %c0_i32 : i32, i32
  }
  func.func @transform_1(%arg0: i32) -> (i32, i32) {
    %c0_i32 = arith.constant 0 : i32
    %c0_i32_0 = arith.constant 0 : i32
    %c0_i32_1 = arith.constant 0 : i32
    return %c0_i32, %c0_i32_0 : i32, i32
  }
  func.func @transform_2(%arg0: i32) -> (i32, i32) {
    %c0_i32 = arith.constant 0 : i32
    %c0_i32_0 = arith.constant 0 : i32
    %c0_i32_1 = arith.constant 0 : i32
    return %c0_i32, %c0_i32_0 : i32, i32
  }
  func.func @transform_3(%arg0: i32) -> (i32, i32) {
    %c0_i32 = arith.constant 0 : i32
    %c0_i32_0 = arith.constant 0 : i32
    %c0_i32_1 = arith.constant 0 : i32
    return %c0_i32, %c0_i32_0 : i32, i32
  }
  func.func @transform_4(%arg0: i32) -> (i32, i32) {
    %c0_i32 = arith.constant 0 : i32
    %c0_i32_0 = arith.constant 0 : i32
    %c0_i32_1 = arith.constant 0 : i32
    return %c0_i32, %c0_i32_0 : i32, i32
  }
  func.func @transform_5(%arg0: i32) -> (i32, i32) {
    %c0_i32 = arith.constant 0 : i32
    %c0_i32_0 = arith.constant 0 : i32
    %c0_i32_1 = arith.constant 0 : i32
    return %c0_i32, %c0_i32_0 : i32, i32
  }
  func.func @transform_6(%arg0: i32) -> (i32, i32) {
    %c0_i32 = arith.constant 0 : i32
    %c0_i32_0 = arith.constant 0 : i32
    %c0_i32_1 = arith.constant 0 : i32
    return %c0_i32, %c0_i32_0 : i32, i32
  }
  func.func @transform_7(%arg0: i32) -> (i32, i32) {
    %c0_i32 = arith.constant 0 : i32
    %c0_i32_0 = arith.constant 0 : i32
    %c0_i32_1 = arith.constant 0 : i32
    return %c0_i32, %c0_i32_0 : i32, i32
  }
  func.func @transform_8(%arg0: i32) -> (i32, i32) {
    %c0_i32 = arith.constant 0 : i32
    %c0_i32_0 = arith.constant 0 : i32
    %c0_i32_1 = arith.constant 0 : i32
    return %c0_i32, %c0_i32_0 : i32, i32
  }
  func.func @transform_9(%arg0: i32) -> (i32, i32) {
    %c0_i32 = arith.constant 0 : i32
    %c0_i32_0 = arith.constant 0 : i32
    %c0_i32_1 = arith.constant 0 : i32
    return %c0_i32, %c0_i32_0 : i32, i32
  }
  func.func @transform_10(%arg0: i32) -> (i32, i32) {
    %c0_i32 = arith.constant 0 : i32
    %c0_i32_0 = arith.constant 0 : i32
    %c0_i32_1 = arith.constant 0 : i32
    return %c0_i32, %c0_i32_0 : i32, i32
  }
  func.func @transform_11(%arg0: i32) -> (i32, i32) {
    %c0_i32 = arith.constant 0 : i32
    %c0_i32_0 = arith.constant 0 : i32
    %c0_i32_1 = arith.constant 0 : i32
    return %c0_i32, %c0_i32_0 : i32, i32
  }
  func.func @transform_12(%arg0: i32) -> (i32, i32) {
    %c0_i32 = arith.constant 0 : i32
    %c0_i32_0 = arith.constant 0 : i32
    %c0_i32_1 = arith.constant 0 : i32
    return %c0_i32, %c0_i32_0 : i32, i32
  }
  func.func @transform_13(%arg0: i32) -> (i32, i32) {
    %c0_i32 = arith.constant 0 : i32
    %c0_i32_0 = arith.constant 0 : i32
    return %arg0, %c0_i32 : i32, i32
  }
}

</mosaic_0001>

<bundles_post_ra>
// kernel: _mlp_forward_impl.1
= control target key start
LH: loop header
LB: loop body
LE: loop exit
PB: predicated region body
PF: predicated region fallthrough
CT: control target
= control target key end

     0   :  { %18 = vsyncpa [#allocation3], 0  ;;  %s1322_s0 = inlined_call_operand.vmem [shape: f32[8,16], index: 0, kind: input, shape index: {}]   ;;  %s1323_s1 = inlined_call_operand.vmem [shape: f32[16,128], index: 1, kind: input, shape index: {}]   ;;  %s1324_s2 = inlined_call_operand.vmem [shape: f32[1,128], index: 2, kind: input, shape index: {}]   ;;  %s1325_s3 = inlined_call_operand.vmem [shape: f32[128,128], index: 3, kind: input, shape index: {}]   ;;  %s1326_s4 = inlined_call_operand.vmem [shape: f32[1,128], index: 4, kind: input, shape index: {}]   ;;  %s1327_s5 = inlined_call_operand.hbm [shape: f32[128,128], index: 5, kind: input, shape index: {}]   ;;  %s1328_s6 = inlined_call_operand.vmem [shape: f32[1,128], index: 6, kind: input, shape index: {}]   ;;  %s1329_s7 = inlined_call_operand.hbm [shape: f32[128,128], index: 7, kind: input, shape index: {}]   ;;  %s1330_s8 = inlined_call_operand.vmem [shape: f32[1,128], index: 8, kind: input, shape index: {}]   ;;  %s1331_s9 = inlined_call_operand.hbm [shape: f32[128,128], index: 9, kind: input, shape index: {}]   ;;  %s1332_s10 = inlined_call_operand.vmem [shape: f32[1,128], index: 10, kind: input, shape index: {}]   ;;  %s1333_s11 = inlined_call_operand.vmem [shape: f32[128,8], index: 11, kind: input, shape index: {}]   ;;  %s1334_s12 = inlined_call_operand.vmem [shape: f32[1,8], index: 12, kind: input, shape index: {}]   ;;  %s1335_s13 = inlined_call_operand.vmem [shape: f32[8,8], index: 13, kind: output, shape index: {}]  }
   0x1   :  { %19 = vsyncpa [#allocation5], 0  ;;  %s1016_s25 = smov [#allocation4]   ;;  %s1017_s27 = smov [#allocation2]  }
   0x2   :  { %s49_s26 = sshll.u32 %s1016_s25, 4  ;;  %s35_s28 = sshll.u32 %s1017_s27, 4  ;;  %s50_s26 = int_to_ptr.vmem [resolvable:$true] %s49_s26  ;;  %s36_s28 = int_to_ptr.vmem [resolvable:$true] %s35_s28 }
   0x3   :  { %s960_s29 = scalar_lea.vmem %s50_s26, 2048  ;;  %p965_p1 = scmp.lt.s32.totalorder %s50_s26, %s50_s26 }
   0x4   :  { %p961_p0 = scmp.ne.s32.totalorder %s50_s26, %s960_s29  ;;  %p966_p2 = scmp.lt.s32.totalorder %s960_s29, %s960_s29 }
   0x6   :  { %p967_p3 = por %p966_p2, %p965_p1 }
   0x8   :  { %p968_p4 = pnand %p967_p3, %p961_p0 }
   0xa   :  { %971 = shalt.err (!%p968_p4)
}
   0xb   :  { %s1018_s30 = smov 128   ;;  %s1019_s14 = smov 8  }
   0xc   :  { %55 = dma.hbm_to_vmem [thread:$0]  %s1329_s7, 2048, %s50_s26, [#allocation5], %s1018_s30, %s1018_s30, %s1019_s14  }
   0xd   :  { %s980_s17 = scalar_lea.vmem %s36_s28, 2048  ;;  %p985_p6 = scmp.lt.s32.totalorder %s36_s28, %s36_s28 }
   0xe   :  { %p981_p5 = scmp.ne.s32.totalorder %s36_s28, %s980_s17  ;;  %p986_p7 = scmp.lt.s32.totalorder %s980_s17, %s980_s17 }
  0x10   :  { %p987_p8 = por %p986_p7, %p985_p6 }
  0x12   :  { %p988_p9 = pnand %p987_p8, %p981_p5 }
  0x14   :  { %991 = shalt.err (!%p988_p9)
}
  0x15   :  { %41 = dma.hbm_to_vmem [thread:$0]  %s1327_s5, 2048, %s36_s28, [#allocation3], %s1018_s30, %s1018_s30, %s1019_s14  }
  0x16   :  { %s1020_s20 = smov [#allocation6]  }
  0x17   :  { %s63_s21 = sshll.u32 %s1020_s20, 4  ;;  %s64_s21 = int_to_ptr.vmem [resolvable:$true] %s63_s21 }
  0x18   :  { %s1000_s22 = scalar_lea.vmem %s64_s21, 2048  ;;  %p1005_p11 = scmp.lt.s32.totalorder %s64_s21, %s64_s21 }
  0x19   :  { %p1001_p10 = scmp.ne.s32.totalorder %s64_s21, %s1000_s22  ;;  %p1006_p12 = scmp.lt.s32.totalorder %s1000_s22, %s1000_s22 }
  0x1b   :  { %p1007_p13 = por %p1006_p12, %p1005_p11 }
  0x1d   :  { %p1008_p0 = pnand %p1007_p13, %p1001_p10 }
  0x1f   :  { %1011 = shalt.err (!%p1008_p0)
}
  0x20   :  { %69 = dma.hbm_to_vmem [thread:$0]  %s1331_s9, 2048, %s64_s21, [#allocation5], %s1018_s30, %s1018_s30, %s1019_s14  }
  0x21   :  { %1012 = dma.done.wait [#allocation3], 2048  }
  0x22   :  { %1013 = vsyncadd [#allocation3], 4294965248 }
  0x23   :  { %1014 = dma.done.wait [#allocation5], 4096  }
  0x24   :  { %1015 = vsyncadd [#allocation5], 4294963200  ;;  %v1021_v0 = vmov 0.0   ;;  %vm1022_vm0 = vmmov 0   ;;  %v87_v1 = vld [vmem:[%s1323_s1 + $0x8] sm:$0xff]  ;;  %v86_v2 = vld [vmem:[%s1323_s1] sm:$0xff] }
  0x25   :  { %749 = vmatprep.subr.mxu0 %v1021_v0  ;;  %753 = vmatprep.mubr.msk.f32.mxu0 %vm1022_vm0, %v1021_v0  ;;  %v85_v3 = vld [vmem:[%s1322_s0] sm:$0xff]  ;;  %vm95_vm1 = vcmask 130048   ;;  %v185_v4 = vld [vmem:[%s1325_s3 + $0x78] sm:$0xff]  ;;  %v184_v5 = vld [vmem:[%s1325_s3 + $0x70] sm:$0xff]  ;;  %vm645_vm2 = vcmask 64512  }
  0x26   :  { %756 = vmatprep.subr.mxu1 %v1021_v0  ;;  %788 = vmatprep.mubr.msk.f32.mxu1 %vm1022_vm0, %v1021_v0  ;;  %v183_v6 = vld [vmem:[%s1325_s3 + $0x68] sm:$0xff]  ;;  %v182_v7 = vld [vmem:[%s1325_s3 + $0x60] sm:$0xff]  ;;  %v181_v8 = vld [vmem:[%s1325_s3 + $0x58] sm:$0xff] }
  0x27   :  { %750 = vmatpush3.msra.mxu0 %v87_v1  ;;  %757 = vmatpush3.msra.mxu1 %v185_v4  ;;  %v180_v9 = vld [vmem:[%s1325_s3 + $0x50] sm:$0xff]  ;;  %v179_v10 = vld [vmem:[%s1325_s3 + $0x48] sm:$0xff]  ;;  %v178_v11 = vld [vmem:[%s1325_s3 + $0x40] sm:$0xff] }
  0x28   :  { %751 = vmatprep.subr.mxu0 %v1021_v0  ;;  %758 = vmatprep.subr.mxu1 %v1021_v0  ;;  %v177_v12 = vld [vmem:[%s1325_s3 + $0x38] sm:$0xff]  ;;  %v176_v13 = vld [vmem:[%s1325_s3 + $0x30] sm:$0xff]  ;;  %v175_v14 = vld [vmem:[%s1325_s3 + $0x28] sm:$0xff] }
  0x29   :  { %752 = vmatpush3.msra.mxu0 %v86_v2  ;;  %759 = vmatpush3.msra.mxu1 %v184_v5  ;;  %v174_v15 = vld [vmem:[%s1325_s3 + $0x20] sm:$0xff]  ;;  %v173_v16 = vld [vmem:[%s1325_s3 + $0x18] sm:$0xff]  ;;  %v172_v17 = vld [vmem:[%s1325_s3 + $0x10] sm:$0xff] }
  0x2a   :  { %754 = vmatmul.mubr.msk.f32.vlgmr.msra.gmra.mxu0 %vm95_vm1, %v85_v3  ;;  %760 = vmatprep.subr.mxu1 %v1021_v0  ;;  %v171_v18 = vld [vmem:[%s1325_s3 + $0x8] sm:$0xff]  ;;  %v170_v19 = vld [vmem:[%s1325_s3] sm:$0xff]  ;;  %v279_v20 = vld [vmem:[#allocation2 + $0x78] sm:$0xff] }
  0x2b   :  { %791 = vmatprep.subr.mxu0 %v1021_v0  ;;  %761 = vmatpush3.msra.mxu1 %v183_v6  ;;  %v278_v21 = vld [vmem:[#allocation2 + $0x70] sm:$0xff]  ;;  %v277_v22 = vld [vmem:[#allocation2 + $0x68] sm:$0xff]  ;;  %v276_v23 = vld [vmem:[#allocation2 + $0x60] sm:$0xff] }
  0x2c   :  { %823 = vmatprep.mubr.msk.f32.mxu0 %vm1022_vm0, %v1021_v0  ;;  %762 = vmatprep.subr.mxu1 %v1021_v0  ;;  %v275_v24 = vld [vmem:[#allocation2 + $0x58] sm:$0xff]  ;;  %v274_v25 = vld [vmem:[#allocation2 + $0x50] sm:$0xff]  ;;  %v273_v26 = vld [vmem:[#allocation2 + $0x48] sm:$0xff] }
  0x2d   :  { %763 = vmatpush3.msra.mxu1 %v182_v7  ;;  %792 = vmatpush3.msra.mxu0 %v279_v20  ;;  %v653_v27 = vld [vmem:[%s1324_s2] ss:$0 sm:$0xff]  ;;  %v271_v33 = vld [vmem:[#allocation2 + $0x38] sm:$0xff]  ;;  %v270_v34 = vld [vmem:[#allocation2 + $0x30] sm:$0xff] }
  0x2e   :  { %764 = vmatprep.subr.mxu1 %v1021_v0  ;;  %793 = vmatprep.subr.mxu0 %v1021_v0  ;;  %v272_v32 = vld [vmem:[#allocation2 + $0x40] sm:$0xff]  ;;  %v269_v35 = vld [vmem:[#allocation2 + $0x28] sm:$0xff]  ;;  %v267_v37 = vld [vmem:[#allocation2 + $0x18] sm:$0xff] }
  0x2f   :  { %765 = vmatpush3.msra.mxu1 %v181_v8  ;;  %794 = vmatpush3.msra.mxu0 %v278_v21  ;;  %v268_v36 = vld [vmem:[#allocation2 + $0x20] sm:$0xff]  ;;  %v266_v38 = vld [vmem:[#allocation2 + $0x10] sm:$0xff]  ;;  %v265_v39 = vld [vmem:[#allocation2 + $0x8] sm:$0xff] }
  0x30   :  { %766 = vmatprep.subr.mxu1 %v1021_v0  ;;  %795 = vmatprep.subr.mxu0 %v1021_v0  ;;  %v264_v40 = vld [vmem:[#allocation2] sm:$0xff]  ;;  %v373_v41 = vld [vmem:[#allocation4 + $0x78] sm:$0xff]  ;;  %v372_v42 = vld [vmem:[#allocation4 + $0x70] sm:$0xff] }
  0x31   :  { %767 = vmatpush3.msra.mxu1 %v180_v9  ;;  %796 = vmatpush3.msra.mxu0 %v277_v22  ;;  %v371_v43 = vld [vmem:[#allocation4 + $0x68] sm:$0xff]  ;;  %v370_v44 = vld [vmem:[#allocation4 + $0x60] sm:$0xff]  ;;  %v369_v45 = vld [vmem:[#allocation4 + $0x58] sm:$0xff] }
  0x32   :  { %768 = vmatprep.subr.mxu1 %v1021_v0  ;;  %797 = vmatprep.subr.mxu0 %v1021_v0  ;;  %v368_v46 = vld [vmem:[#allocation4 + $0x50] sm:$0xff]  ;;  %v367_v47 = vld [vmem:[#allocation4 + $0x48] sm:$0xff]  ;;  %v655_v48 = vld [vmem:[%s1326_s4] ss:$0 sm:$0xff] }
  0x33   :  { %769 = vmatpush3.msra.mxu1 %v179_v10  ;;  %798 = vmatpush3.msra.mxu0 %v276_v23  ;;  %v366_v53 = vld [vmem:[#allocation4 + $0x40] sm:$0xff]  ;;  %v365_v54 = vld [vmem:[#allocation4 + $0x38] sm:$0xff]  ;;  %v364_v55 = vld [vmem:[#allocation4 + $0x30] sm:$0xff] }
  0x34   :  { %770 = vmatprep.subr.mxu1 %v1021_v0  ;;  %799 = vmatprep.subr.mxu0 %v1021_v0  ;;  %v363_v56 = vld [vmem:[#allocation4 + $0x28] sm:$0xff]  ;;  %v362_v57 = vld [vmem:[#allocation4 + $0x20] sm:$0xff]  ;;  %v361_v58 = vld [vmem:[#allocation4 + $0x18] sm:$0xff] }
  0x35   :  { %771 = vmatpush3.msra.mxu1 %v178_v11  ;;  %800 = vmatpush3.msra.mxu0 %v275_v24  ;;  %v360_v59 = vld [vmem:[#allocation4 + $0x10] sm:$0xff]  ;;  %v359_v60 = vld [vmem:[#allocation4 + $0x8] sm:$0xff]  ;;  %v358_v61 = vld [vmem:[#allocation4] sm:$0xff] }
  0x36   :  { %772 = vmatprep.subr.mxu1 %v1021_v0  ;;  %801 = vmatprep.subr.mxu0 %v1021_v0  ;;  %v467_v62 = vld [vmem:[#allocation6 + $0x78] sm:$0xff]  ;;  %v466_v63 = vld [vmem:[#allocation6 + $0x70] sm:$0xff]  ;;  %v465_v1 = vld [vmem:[#allocation6 + $0x68] sm:$0xff] }
  0x37   :  { %773 = vmatpush3.msra.mxu1 %v177_v12  ;;  %802 = vmatpush3.msra.mxu0 %v274_v25  ;;  %v464_v2 = vld [vmem:[#allocation6 + $0x60] sm:$0xff]  ;;  %v463_v3 = vld [vmem:[#allocation6 + $0x58] sm:$0xff]  ;;  %v462_v4 = vld [vmem:[#allocation6 + $0x50] sm:$0xff] }
  0x38   :  { %774 = vmatprep.subr.mxu1 %v1021_v0  ;;  %803 = vmatprep.subr.mxu0 %v1021_v0  ;;  %v461_v5 = vld [vmem:[#allocation6 + $0x48] sm:$0xff]  ;;  %v656_v6 = vld [vmem:[%s1328_s6] ss:$0 sm:$0xff]  ;;  %v459_v12 = vld [vmem:[#allocation6 + $0x38] sm:$0xff] }
  0x39   :  { %775 = vmatpush3.msra.mxu1 %v176_v13  ;;  %804 = vmatpush3.msra.mxu0 %v273_v26  ;;  %v460_v11 = vld [vmem:[#allocation6 + $0x40] sm:$0xff]  ;;  %v458_v13 = vld [vmem:[#allocation6 + $0x30] sm:$0xff]  ;;  %v561_v20 = vld [vmem:[%s1333_s11 + $0x78] sm:$0xff] }
  0x3a   :  { %776 = vmatprep.subr.mxu1 %v1021_v0  ;;  %805 = vmatprep.subr.mxu0 %v1021_v0  ;;  %v560_v21 = vld [vmem:[%s1333_s11 + $0x70] sm:$0xff]  ;;  %v559_v22 = vld [vmem:[%s1333_s11 + $0x68] sm:$0xff]  ;;  %v558_v23 = vld [vmem:[%s1333_s11 + $0x60] sm:$0xff] }
  0x3b   :  { %777 = vmatpush3.msra.mxu1 %v175_v14  ;;  %806 = vmatpush3.msra.mxu0 %v272_v32  ;;  %v457_v14 = vld [vmem:[#allocation6 + $0x28] sm:$0xff]  ;;  %v557_v24 = vld [vmem:[%s1333_s11 + $0x58] sm:$0xff]  ;;  %v556_v25 = vld [vmem:[%s1333_s11 + $0x50] sm:$0xff] }
  0x3c   :  { %778 = vmatprep.subr.mxu1 %v1021_v0  ;;  %807 = vmatprep.subr.mxu0 %v1021_v0  ;;  %v555_v26 = vld [vmem:[%s1333_s11 + $0x48] sm:$0xff]  ;;  %v554_v32 = vld [vmem:[%s1333_s11 + $0x40] sm:$0xff] }
  0x3d   :  { %779 = vmatpush3.msra.mxu1 %v174_v15  ;;  %808 = vmatpush3.msra.mxu0 %v271_v33  ;;  %v456_v15 = vld [vmem:[#allocation6 + $0x20] sm:$0xff]  ;;  %v553_v33 = vld [vmem:[%s1333_s11 + $0x38] sm:$0xff] }
  0x3e   :  { %780 = vmatprep.subr.mxu1 %v1021_v0  ;;  %809 = vmatprep.subr.mxu0 %v1021_v0 }
  0x3f   :  { %781 = vmatpush3.msra.mxu1 %v173_v16  ;;  %810 = vmatpush3.msra.mxu0 %v270_v34  ;;  %v455_v16 = vld [vmem:[#allocation6 + $0x18] sm:$0xff]  ;;  %v552_v34 = vld [vmem:[%s1333_s11 + $0x30] sm:$0xff] }
  0x40   :  { %782 = vmatprep.subr.mxu1 %v1021_v0  ;;  %811 = vmatprep.subr.mxu0 %v1021_v0 }
  0x41   :  { %783 = vmatpush3.msra.mxu1 %v172_v17  ;;  %812 = vmatpush3.msra.mxu0 %v269_v35  ;;  %v454_v17 = vld [vmem:[#allocation6 + $0x10] sm:$0xff]  ;;  %v551_v35 = vld [vmem:[%s1333_s11 + $0x28] sm:$0xff] }
  0x42   :  { %784 = vmatprep.subr.mxu1 %v1021_v0  ;;  %813 = vmatprep.subr.mxu0 %v1021_v0 }
  0x43   :  { %785 = vmatpush3.msra.mxu1 %v171_v18  ;;  %814 = vmatpush3.msra.mxu0 %v268_v36  ;;  %v453_v18 = vld [vmem:[#allocation6 + $0x8] sm:$0xff]  ;;  %v550_v36 = vld [vmem:[%s1333_s11 + $0x20] sm:$0xff] }
  0x44   :  { %786 = vmatprep.subr.mxu1 %v1021_v0  ;;  %815 = vmatprep.subr.mxu0 %v1021_v0 }
  0x45   :  { %787 = vmatpush3.msra.mxu1 %v170_v19  ;;  %816 = vmatpush3.msra.mxu0 %v267_v37  ;;  %v452_v19 = vld [vmem:[#allocation6] sm:$0xff]  ;;  %v549_v37 = vld [vmem:[%s1333_s11 + $0x18] sm:$0xff] }
  0x46   :  { %826 = vmatprep.subr.mxu1 %v1021_v0  ;;  %817 = vmatprep.subr.mxu0 %v1021_v0 }
  0x47   :  { %818 = vmatpush3.msra.mxu0 %v266_v38  ;;  %v548_v38 = vld [vmem:[%s1333_s11 + $0x10] sm:$0xff] }
  0x48   :  { %819 = vmatprep.subr.mxu0 %v1021_v0 }
  0x49   :  { %820 = vmatpush3.msra.mxu0 %v265_v39  ;;  %v547_v39 = vld [vmem:[%s1333_s11 + $0x8] sm:$0xff] }
  0x4a   :  { %821 = vmatprep.subr.mxu0 %v1021_v0 }
  0x4b   :  { %822 = vmatpush3.msra.mxu0 %v264_v40  ;;  %v546_v40 = vld [vmem:[%s1333_s11] sm:$0xff] }
  0x4c   :  { %861 = vmatprep.subr.mxu0 %v1021_v0 }
  0xea   :  { %v165_v28 = vpop.f32.mrf.mxu0 }
  0xeb   :  { %v166_v29 = vadd.f32 %v653_v27, %v165_v28  ;;  %v657_v27 = vld [vmem:[%s1330_s8] ss:$0 sm:$0xff] }
  0xec   :  { %v755_v30 = vpop.f32.mrf.mxu0 }
  0xed   :  { %938 = vtanh.f32 %v166_v29 }
  0xfa   :  { %v939_v31 = vpop.eup %938 }
  0xfb   :  { %789 = vmatmul.mubr.f32.vlgmr.msra.gmra.mxu1 %v939_v31 }
  0xfc   :  { %858 = vmatprep.mubr.msk.f32.mxu1 %vm1022_vm0, %v1021_v0  ;;  %827 = vmatpush3.msra.mxu1 %v373_v41  ;;  %v658_v41 = vld [vmem:[%s1332_s10] ss:$0 sm:$0xff] }
  0xfd   :  { %828 = vmatprep.subr.mxu1 %v1021_v0 }
  0xfe   :  { %829 = vmatpush3.msra.mxu1 %v372_v42 }
  0xff   :  { %830 = vmatprep.subr.mxu1 %v1021_v0 }
 0x100   :  { %831 = vmatpush3.msra.mxu1 %v371_v43 }
 0x101   :  { %832 = vmatprep.subr.mxu1 %v1021_v0 }
 0x102   :  { %833 = vmatpush3.msra.mxu1 %v370_v44 }
 0x103   :  { %834 = vmatprep.subr.mxu1 %v1021_v0 }
 0x104   :  { %835 = vmatpush3.msra.mxu1 %v369_v45 }
 0x105   :  { %836 = vmatprep.subr.mxu1 %v1021_v0 }
 0x106   :  { %837 = vmatpush3.msra.mxu1 %v368_v46  ;;  %v659_v46 = vld [vmem:[%s1334_s12] ss:$0 sm:$0xff] }
 0x107   :  { %838 = vmatprep.subr.mxu1 %v1021_v0 }
 0x108   :  { %839 = vmatpush3.msra.mxu1 %v367_v47 }
 0x109   :  { %840 = vmatprep.subr.mxu1 %v1021_v0 }
 0x10a   :  { %841 = vmatpush3.msra.mxu1 %v366_v53 }
 0x10b   :  { %842 = vmatprep.subr.mxu1 %v1021_v0 }
 0x10c   :  { %843 = vmatpush3.msra.mxu1 %v365_v54 }
 0x10d   :  { %844 = vmatprep.subr.mxu1 %v1021_v0 }
 0x10e   :  { %845 = vmatpush3.msra.mxu1 %v364_v55 }
 0x10f   :  { %846 = vmatprep.subr.mxu1 %v1021_v0 }
 0x110   :  { %847 = vmatpush3.msra.mxu1 %v363_v56 }
 0x111   :  { %848 = vmatprep.subr.mxu1 %v1021_v0 }
 0x112   :  { %849 = vmatpush3.msra.mxu1 %v362_v57 }
 0x113   :  { %850 = vmatprep.subr.mxu1 %v1021_v0 }
 0x114   :  { %851 = vmatpush3.msra.mxu1 %v361_v58 }
 0x115   :  { %852 = vmatprep.subr.mxu1 %v1021_v0 }
 0x116   :  { %853 = vmatpush3.msra.mxu1 %v360_v59 }
 0x117   :  { %854 = vmatprep.subr.mxu1 %v1021_v0 }
 0x118   :  { %855 = vmatpush3.msra.mxu1 %v359_v60 }
 0x119   :  { %856 = vmatprep.subr.mxu1 %v1021_v0 }
 0x11a   :  { %857 = vmatpush3.msra.mxu1 %v358_v61 }
 0x11b   :  { %896 = vmatprep.subr.mxu1 %v1021_v0 }
 0x1bb   :  { %v259_v49 = vpop.f32.mrf.mxu1 }
 0x1bc   :  { %v260_v50 = vadd.f32 %v655_v48, %v259_v49 }
 0x1bd   :  { %v790_v51 = vpop.f32.mrf.mxu1 }
 0x1be   :  { %940 = vtanh.f32 %v260_v50 }
 0x1cb   :  { %v941_v52 = vpop.eup %940 }
 0x1cc   :  { %824 = vmatmul.mubr.f32.vlgmr.msra.gmra.mxu0 %v941_v52 }
 0x1cd   :  { %893 = vmatprep.mubr.msk.f32.mxu0 %vm1022_vm0, %v1021_v0  ;;  %862 = vmatpush3.msra.mxu0 %v467_v62 }
 0x1ce   :  { %863 = vmatprep.subr.mxu0 %v1021_v0 }
 0x1cf   :  { %864 = vmatpush3.msra.mxu0 %v466_v63 }
 0x1d0   :  { %865 = vmatprep.subr.mxu0 %v1021_v0 }
 0x1d1   :  { %866 = vmatpush3.msra.mxu0 %v465_v1 }
 0x1d2   :  { %867 = vmatprep.subr.mxu0 %v1021_v0 }
 0x1d3   :  { %868 = vmatpush3.msra.mxu0 %v464_v2 }
 0x1d4   :  { %869 = vmatprep.subr.mxu0 %v1021_v0 }
 0x1d5   :  { %870 = vmatpush3.msra.mxu0 %v463_v3 }
 0x1d6   :  { %871 = vmatprep.subr.mxu0 %v1021_v0 }
 0x1d7   :  { %872 = vmatpush3.msra.mxu0 %v462_v4 }
 0x1d8   :  { %873 = vmatprep.subr.mxu0 %v1021_v0 }
 0x1d9   :  { %874 = vmatpush3.msra.mxu0 %v461_v5 }
 0x1da   :  { %875 = vmatprep.subr.mxu0 %v1021_v0 }
 0x1db   :  { %876 = vmatpush3.msra.mxu0 %v460_v11 }
 0x1dc   :  { %877 = vmatprep.subr.mxu0 %v1021_v0 }
 0x1dd   :  { %878 = vmatpush3.msra.mxu0 %v459_v12 }
 0x1de   :  { %879 = vmatprep.subr.mxu0 %v1021_v0 }
 0x1df   :  { %880 = vmatpush3.msra.mxu0 %v458_v13 }
 0x1e0   :  { %881 = vmatprep.subr.mxu0 %v1021_v0 }
 0x1e1   :  { %882 = vmatpush3.msra.mxu0 %v457_v14 }
 0x1e2   :  { %883 = vmatprep.subr.mxu0 %v1021_v0 }
 0x1e3   :  { %884 = vmatpush3.msra.mxu0 %v456_v15 }
 0x1e4   :  { %885 = vmatprep.subr.mxu0 %v1021_v0 }
 0x1e5   :  { %886 = vmatpush3.msra.mxu0 %v455_v16 }
 0x1e6   :  { %887 = vmatprep.subr.mxu0 %v1021_v0 }
 0x1e7   :  { %888 = vmatpush3.msra.mxu0 %v454_v17 }
 0x1e8   :  { %889 = vmatprep.subr.mxu0 %v1021_v0 }
 0x1e9   :  { %890 = vmatpush3.msra.mxu0 %v453_v18 }
 0x1ea   :  { %891 = vmatprep.subr.mxu0 %v1021_v0 }
 0x1eb   :  { %892 = vmatpush3.msra.mxu0 %v452_v19 }
 0x28c   :  { %v353_v7 = vpop.f32.mrf.mxu0 }
 0x28d   :  { %v354_v8 = vadd.f32 %v656_v6, %v353_v7 }
 0x28e   :  { %v825_v9 = vpop.f32.mrf.mxu0 }
 0x28f   :  { %942 = vtanh.f32 %v354_v8 }
 0x29c   :  { %v943_v10 = vpop.eup %942 }
 0x29d   :  { %859 = vmatmul.mubr.f32.vlgmr.msra.gmra.mxu1 %v943_v10 }
 0x29e   :  { %928 = vmatprep.mubr.msk.f32.mxu1 %vm1022_vm0, %v1021_v0  ;;  %897 = vmatpush3.msra.mxu1 %v561_v20 }
 0x29f   :  { %898 = vmatprep.subr.mxu1 %v1021_v0 }
 0x2a0   :  { %899 = vmatpush3.msra.mxu1 %v560_v21 }
 0x2a1   :  { %900 = vmatprep.subr.mxu1 %v1021_v0 }
 0x2a2   :  { %901 = vmatpush3.msra.mxu1 %v559_v22 }
 0x2a3   :  { %902 = vmatprep.subr.mxu1 %v1021_v0 }
 0x2a4   :  { %903 = vmatpush3.msra.mxu1 %v558_v23 }
 0x2a5   :  { %904 = vmatprep.subr.mxu1 %v1021_v0 }
 0x2a6   :  { %905 = vmatpush3.msra.mxu1 %v557_v24 }
 0x2a7   :  { %906 = vmatprep.subr.mxu1 %v1021_v0 }
 0x2a8   :  { %907 = vmatpush3.msra.mxu1 %v556_v25 }
 0x2a9   :  { %908 = vmatprep.subr.mxu1 %v1021_v0 }
 0x2aa   :  { %909 = vmatpush3.msra.mxu1 %v555_v26 }
 0x2ab   :  { %910 = vmatprep.subr.mxu1 %v1021_v0 }
 0x2ac   :  { %911 = vmatpush3.msra.mxu1 %v554_v32 }
 0x2ad   :  { %912 = vmatprep.subr.mxu1 %v1021_v0 }
 0x2ae   :  { %913 = vmatpush3.msra.mxu1 %v553_v33 }
 0x2af   :  { %914 = vmatprep.subr.mxu1 %v1021_v0 }
 0x2b0   :  { %915 = vmatpush3.msra.mxu1 %v552_v34 }
 0x2b1   :  { %916 = vmatprep.subr.mxu1 %v1021_v0 }
 0x2b2   :  { %917 = vmatpush3.msra.mxu1 %v551_v35 }
 0x2b3   :  { %918 = vmatprep.subr.mxu1 %v1021_v0 }
 0x2b4   :  { %919 = vmatpush3.msra.mxu1 %v550_v36 }
 0x2b5   :  { %920 = vmatprep.subr.mxu1 %v1021_v0 }
 0x2b6   :  { %921 = vmatpush3.msra.mxu1 %v549_v37 }
 0x2b7   :  { %922 = vmatprep.subr.mxu1 %v1021_v0 }
 0x2b8   :  { %923 = vmatpush3.msra.mxu1 %v548_v38 }
 0x2b9   :  { %924 = vmatprep.subr.mxu1 %v1021_v0 }
 0x2ba   :  { %925 = vmatpush3.msra.mxu1 %v547_v39 }
 0x2bb   :  { %926 = vmatprep.subr.mxu1 %v1021_v0 }
 0x2bc   :  { %927 = vmatpush3.msra.mxu1 %v546_v40 }
 0x35d   :  { %v447_v28 = vpop.f32.mrf.mxu1 }
 0x35e   :  { %v448_v29 = vadd.f32 %v657_v27, %v447_v28 }
 0x35f   :  { %v860_v30 = vpop.f32.mrf.mxu1 }
 0x360   :  { %944 = vtanh.f32 %v448_v29 }
 0x36d   :  { %v945_v31 = vpop.eup %944 }
 0x36e   :  { %894 = vmatmul.mubr.f32.vlgmr.msra.gmra.mxu0 %v945_v31 }
 0x42e   :  { %v541_v42 = vpop.f32.mrf.mxu0 }
 0x42f   :  { %v542_v43 = vadd.f32 %v658_v41, %v541_v42 }
 0x430   :  { %v895_v44 = vpop.f32.mrf.mxu0 }
 0x431   :  { %946 = vtanh.f32 %v542_v43 }
 0x43e   :  { %v947_v45 = vpop.eup %946 }
 0x43f   :  { %929 = vmatmul.mubr.f32.vlgmr.msra.gmra.mxu1 %v947_v45 }
 0x4ff   :  { %v635_v47 = vpop.f32.mrf.mxu1 }
 0x500   :  { %v636_v48 = vadd.f32 %v659_v46, %v635_v47 }
 0x501   :  { %v930_v49 = vpop.f32.mrf.mxu1 }
 0x502   :  { %v660_v50 = vmul.f32 -1.442695, %v636_v48 }
 0x504   :  { %948 = vpow2.f32 %v660_v50 }
 0x511   :  { %v949_v0 = vpop.eup %948 }
 0x512   :  { %v642_v51 = vadd.f32 1.0, %v949_v0 }
 0x514   :  { %950 = vrcp.f32 %v642_v51 }
 0x521   :  { %v951_v52 = vpop.eup %950 }
 0x522   :  { %646 = vst.msk [vmem:[%s1335_s13] sm:$0xff] %vm645_vm2, %v951_v52 }
 0x523   :  { %651 = vsyncpa [#allocation3], 1 }
 0x524   :  { %652 = vsyncpa [#allocation5], 1 }

</bundles_post_ra>
